<compile_context>
chip_gen: v5e
topology: v5e:2x2
jax: 0.10.0
libtpu: 0.0.40
codegen_flags: <defaults>
</compile_context>

<pallas_src>
import functools

import jax
import jax.numpy as jnp
import numpy as np
from jax.experimental import pallas as pl
from jax.experimental.pallas import tpu as pltpu


# ---------------------------------------------------------------------------
# Kernels
# ---------------------------------------------------------------------------
def _gram_partial_kernel(f_ref, scale_ref, g_ref, *, m, needs_mask):
    """Accumulate scale * (F_p @ F_p.T) for this split's K-slice into its slab.

    Grid: (P, kt_per_split). g_ref is the resident (1, n, n) output slab for
    split p; it is zeroed at k==0, accumulated into every step, and scaled in
    place on the last K step (no separate acc scratch).
    """
    p = pl.program_id(0)
    k = pl.program_id(1)

    @pl.when(k == 0)
    def _():
        g_ref[...] = jnp.zeros_like(g_ref)

    fk = f_ref[...]                                   # (n, tk) streamed tile (bf16)
    if needs_mask:
        # Ragged / excess K tiles: zero columns at-or-beyond the true K extent.
        # Cheap VPU filler in a mem/MXU-bound loop; uses the *unclamped* global
        # column so fully-excess tiles (clamped in the index_map) contribute 0.
        tk = fk.shape[-1]
        col0 = (p * pl.num_programs(1) + k) * tk
        col = col0 + jax.lax.broadcasted_iota(jnp.int32, (1, tk), 1)
        fk = jnp.where(col < m, fk, jnp.zeros_like(fk))

    g_ref[...] += jax.lax.dot_general(                # MXU, f32 accumulation
        fk, fk, dimension_numbers=(((1,), (1,)), ((), ())),
        preferred_element_type=jnp.float32)[None]

    @pl.when(k == pl.num_programs(1) - 1)
    def _():
        g_ref[...] *= scale_ref[0]                    # weight / (a*b*c*d)


def _finalize_style_kernel(gp_ref, t_ref, inv_nn_ref, g_ref, loss_ref):
    """Sum the per-split partial Gram slabs, emit G and the MSE-vs-target loss.

    Grid: (row_tiles,).  The scalar loss lives in SMEM and accumulates across
    row tiles; the target is only touched here (not resident during streaming).
    """
    r = pl.program_id(0)
    g = jnp.sum(gp_ref[...], axis=0)                  # (tr, n) combined Gram rows
    g_ref[...] = g
    diff = g - t_ref[...]
    part = jnp.sum(diff * diff) * inv_nn_ref[0]

    @pl.when(r == 0)
    def _():
        loss_ref[0] = part

    @pl.when(r != 0)
    def _():
        loss_ref[0] += part


# ---------------------------------------------------------------------------
# Tiling / VMEM heuristics
# ---------------------------------------------------------------------------
def _physical_vmem_bytes():
    try:
        return int(getattr(pltpu.get_tpu_info(), "vmem_capacity_bytes", 64 << 20))
    except Exception:
        return 64 << 20          # conservative default: v7x per-TensorCore VMEM


def _choose_k_tile(n_rows, m, itemsize, tile_bytes):
    """Widest lane-dense K tile: full m if it fits, else the largest multiple
    of 128 lanes whose (n_rows, tk) block fits `tile_bytes`.  Never shrunk to
    divide m — the ragged tail is masked in-kernel instead."""
    if n_rows * m * itemsize <= tile_bytes:
        return m
    tk = (tile_bytes // (n_rows * itemsize)) // 128 * 128
    return int(max(128, tk))


def _choose_row_tile(n, p_splits, budget_bytes=4 << 20):
    """Row tile for the finalize kernel: keep (P slabs + target + G) row blocks
    under ~4 MiB so double-buffering stays within even the v5e default limit."""
    blocks = p_splits + 2
    if blocks * n * n * 4 <= budget_bytes or n % 8 != 0:
        return n
    tr = (budget_bytes // (blocks * n * 4)) // 8 * 8
    tr = int(min(max(tr, 8), n))
    while n % tr:
        tr -= 8
    return tr


# ---------------------------------------------------------------------------
# Wrappers
# ---------------------------------------------------------------------------
def _gram_partials(x, scale, *, num_k_splits=2, max_tile_bytes=None,
                   stream_dtype=jnp.bfloat16):
    """Return (P, n, n) per-K-split partial Gram slabs, each scaled by `scale`."""
    a, b, c, d = x.shape
    n, m = a * b, c * d
    f = x.reshape(n, m)                               # free (contiguous) reshape
    if stream_dtype is not None and f.dtype != stream_dtype:
        f = f.astype(stream_dtype)                    # bf16 streaming, f32 accum
    itemsize = jnp.dtype(f.dtype).itemsize

    phys_vmem = _physical_vmem_bytes()
    tile_bytes = int(max_tile_bytes or min(4 << 20, phys_vmem // 16))
    tk = _choose_k_tile(n, m, itemsize, tile_bytes)

    kt_valid = pl.cdiv(m, tk)                         # K tiles actually covering F
    p_splits = max(1, min(int(num_k_splits), kt_valid))
    kt_pc = pl.cdiv(kt_valid, p_splits)               # K tiles per split (per core)
    needs_mask = (p_splits * kt_pc * tk != m)         # ragged tail or excess tiles

    if needs_mask:
        last_blk = kt_valid - 1

        def f_index_map(p, k):                        # clamp excess tiles; the
            return (0, jnp.minimum(p * kt_pc + k, last_blk))  # in-kernel mask zeroes them
    else:
        def f_index_map(p, k):
            return (0, p * kt_pc + k)

    # Explicit VMEM budget: double-buffered output slab + double-buffered F tiles.
    needed = 2 * n * n * 4 + 2 * n * tk * itemsize + (4 << 20)
    vmem_limit = int(min(phys_vmem - (4 << 20), max(32 << 20, needed)))

    kernel = functools.partial(_gram_partial_kernel, m=m, needs_mask=needs_mask)
    return pl.pallas_call(
        kernel,
        out_shape=jax.ShapeDtypeStruct((p_splits, n, n), jnp.float32),
        grid_spec=pltpu.PrefetchScalarGridSpec(
            num_scalar_prefetch=0,
            grid=(p_splits, kt_pc),
            in_specs=[
                # NOTE: add pipeline_mode=pl.Buffered(3) here if v7x traces show
                # exposed DMA at small n (tiles are small after bf16 streaming).
                pl.BlockSpec((n, tk), f_index_map),
                pl.BlockSpec(memory_space=pltpu.SMEM),        # scale scalar
            ],
            out_specs=pl.BlockSpec((1, n, n), lambda p, k: (p, 0, 0)),
        ),
        compiler_params=pltpu.CompilerParams(
            dimension_semantics=("parallel", "arbitrary"),    # K-split || , K loop
            vmem_limit_bytes=vmem_limit),
    )(f, jnp.asarray([scale], dtype=jnp.float32))


def _style_gram_and_loss(x, target_scaled, weight, *, num_k_splits=2,
                         max_tile_bytes=None):
    """Returns (gram(x)*weight, MSE(gram(x)*weight, target_scaled))."""
    a, b, c, d = x.shape
    n = a * b
    scale = float(weight) / float(a * b * c * d)
    partials = _gram_partials(x, scale, num_k_splits=num_k_splits,
                              max_tile_bytes=max_tile_bytes)
    p_splits = partials.shape[0]
    tr = _choose_row_tile(n, p_splits)
    inv_nn = jnp.asarray([1.0 / float(n * n)], dtype=jnp.float32)

    g, loss = pl.pallas_call(
        _finalize_style_kernel,
        out_shape=(jax.ShapeDtypeStruct((n, n), jnp.float32),
                   jax.ShapeDtypeStruct((1,), jnp.float32)),
        grid_spec=pltpu.PrefetchScalarGridSpec(
            num_scalar_prefetch=0,
            grid=(n // tr,),
            in_specs=[
                pl.BlockSpec((p_splits, tr, n), lambda r: (0, r, 0)),
                pl.BlockSpec((tr, n), lambda r: (r, 0)),
                pl.BlockSpec(memory_space=pltpu.SMEM),        # 1/(n*n)
            ],
            out_specs=(
                pl.BlockSpec((tr, n), lambda r: (r, 0)),      # G (weight-scaled)
                pl.BlockSpec(memory_space=pltpu.SMEM),        # scalar loss
            ),
        ),
        compiler_params=pltpu.CompilerParams(
            dimension_semantics=("arbitrary",)),              # loss accumulates
    )(partials, target_scaled.astype(jnp.float32), inv_nn)
    return g, loss[0]


# ---------------------------------------------------------------------------
# Module-equivalents
# ---------------------------------------------------------------------------
class GramMatrix:
    """JAX/Pallas equivalent of the PyTorch GramMatrix module."""

    def __init__(self, num_k_splits=2):
        self.num_k_splits = num_k_splits

    def forward(self, x):
        a, b, c, d = x.shape
        partials = _gram_partials(x, 1.0 / float(a * b * c * d),
                                  num_k_splits=self.num_k_splits)
        # Tiny O(n^2) combine of the per-split slabs (single slab when P == 1).
        return partials[0] if partials.shape[0] == 1 else jnp.sum(partials, axis=0)

    __call__ = forward


class StyleLoss:
    """JAX/Pallas equivalent of the PyTorch StyleLoss module (forward only)."""

    def __init__(self, target, weight, num_k_splits=2):
        # mirrors: self.target = target.detach() * weight   (plain-JAX glue)
        self.weight = float(weight)
        self.target = jax.lax.stop_gradient(jnp.asarray(target)) * self.weight
        self.num_k_splits = num_k_splits
        self.gram = GramMatrix(num_k_splits)
        self.G = None
        self.loss = None
        self.output = None

    def forward(self, x):
        # input.clone() -> identity pass-through (JAX arrays are immutable).
        self.output = x
        self.G, self.loss = _style_gram_and_loss(
            x, self.target, self.weight, num_k_splits=self.num_k_splits)
        return self.output

    __call__ = forward
    # TODO(synk): StyleLoss.backward (autograd / retain_graph) not ported —
    #             this is the forward pass only.


# ---------------------------------------------------------------------------
# Demo / correctness check
# ---------------------------------------------------------------------------
def _gram_reference(x):
    a, b, c, d = x.shape
    f = x.reshape(a * b, c * d).astype(jnp.float32)
    g = jnp.matmul(f, f.T, precision=jax.lax.Precision.HIGHEST)
    return g / (a * b * c * d)


if __name__ == "__main__":
    key = jax.random.PRNGKey(0)
    k1, k2, k3, k4 = jax.random.split(key, 4)

    # VGG-like style feature map: n = B*C = 128 Gram rows, K = H*W = 256.
    B, C, H, W = 2, 64, 16, 16
    x = jax.random.normal(k1, (B, C, H, W), dtype=jnp.float32)
    target_feature = jax.random.normal(k2, (B, C, H, W), dtype=jnp.float32)
    weight = 0.75

    # As in neural-style, the StyleLoss target is the Gram of the target feature.
    target_gram = _gram_reference(target_feature)

    module = StyleLoss(target_gram, weight)
    out = jax.block_until_ready(module(x))
    G = jax.block_until_ready(module.G)
    loss = jax.block_until_ready(module.loss)

    # Plain-JAX references (same semantics as the PyTorch module).
    ref_G = _gram_reference(x) * weight
    ref_loss = jnp.mean((ref_G - target_gram * weight) ** 2)

    assert out.shape == x.shape and out.dtype == x.dtype
    np.testing.assert_allclose(np.asarray(out), np.asarray(x))
    # Tolerances account for bf16 streaming (f32 accumulation retained).
    np.testing.assert_allclose(np.asarray(G), np.asarray(ref_G),
                               rtol=2e-2, atol=5e-4)
    np.testing.assert_allclose(float(loss), float(ref_loss),
                               rtol=2e-2, atol=1e-9)

    # Dependent module: standalone GramMatrix kernel.
    g_plain = jax.block_until_ready(GramMatrix()(x))
    np.testing.assert_allclose(np.asarray(g_plain), np.asarray(_gram_reference(x)),
                               rtol=2e-2, atol=5e-4)

    # Exercise the ragged-K / K-split / in-kernel-mask path: an unaligned K
    # extent (H*W = 272) with a tiny tile budget forcing 128-lane tiles.
    x2 = jax.random.normal(k3, (2, 4, 16, 17), dtype=jnp.float32)
    t2 = _gram_reference(jax.random.normal(k4, (2, 4, 16, 17), dtype=jnp.float32))
    w2 = 0.5
    g2, l2 = _style_gram_and_loss(x2, t2 * w2, w2, num_k_splits=2,
                                  max_tile_bytes=2048)
    g2 = jax.block_until_ready(g2)
    l2 = jax.block_until_ready(l2)
    ref_g2 = _gram_reference(x2) * w2
    ref_l2 = jnp.mean((ref_g2 - t2 * w2) ** 2)
    np.testing.assert_allclose(np.asarray(g2), np.asarray(ref_g2),
                               rtol=2e-2, atol=5e-4)
    np.testing.assert_allclose(float(l2), float(ref_l2), rtol=2e-2, atol=1e-9)

    print("KERNEL_OK")
</pallas_src>

<mosaic_0001>
module attributes {stable_mosaic.version = 11 : i64} {
  func.func @_gram_partial_kernel(%arg0: i32, %arg1: i32, %arg2: memref<128x256xbf16, #tpu.memory_space<vmem>>, %arg3: memref<1xf32, #tpu.memory_space<smem>>, %arg4: memref<1x128x128xf32, #tpu.memory_space<vmem>>) attributes {dimension_semantics = [#tpu.dimension_semantics<parallel>, #tpu.dimension_semantics<arbitrary>], iteration_bounds = array<i64: 1, 1>, scalar_prefetch = 0 : i64, scratch_operands = 0 : i64, tpu.core_type = #tpu.core_type<tc>, window_params = [{transform_indices = @transform_0, window_bounds = array<i64: 128, 256>}, {transform_indices = @transform_1, window_bounds = array<i64: 1>}, {transform_indices = @transform_2, window_bounds = array<i64: 1, 128, 128>}]} {
    %c0_i32 = arith.constant 0 : i32
    %0 = arith.cmpi eq, %arg1, %c0_i32 : i32
    %1 = arith.extui %0 : i1 to i32
    %c0_i32_0 = arith.constant 0 : i32
    %2 = arith.cmpi ne, %1, %c0_i32_0 : i32
    scf.if %2 {
      %cst_10 = arith.constant 0.000000e+00 : f32
      %12 = vector.broadcast %cst_10 : f32 to vector<1x128x128xf32>
      %c0_11 = arith.constant 0 : index
      %c0_12 = arith.constant 0 : index
      %c0_13 = arith.constant 0 : index
      %13 = vector.load %arg4[%c0_11, %c0_12, %c0_13] : memref<1x128x128xf32, #tpu.memory_space<vmem>>, vector<1x128x128xf32>
      tpu.vector_store %arg4[%c0_11, %c0_12, %c0_13], %12 {strides = array<i32>} : memref<1x128x128xf32, #tpu.memory_space<vmem>>, vector<1x128x128xf32>,
    } else {
    }
    %c0 = arith.constant 0 : index
    %c0_1 = arith.constant 0 : index
    %3 = vector.load %arg2[%c0, %c0_1] : memref<128x256xbf16, #tpu.memory_space<vmem>>, vector<128x256xbf16>
    %c0_2 = arith.constant 0 : index
    %c0_3 = arith.constant 0 : index
    %c0_4 = arith.constant 0 : index
    %4 = vector.load %arg4[%c0_2, %c0_3, %c0_4] : memref<1x128x128xf32, #tpu.memory_space<vmem>>, vector<1x128x128xf32>
    %cst = arith.constant dense<0.000000e+00> : vector<128x128xf32>
    %5 = tpu.matmul %3, %3, %cst {dimension_numbers = #tpu.dot_dimension_numbers<[1], [1], [0], [0], [0, 0, 1, 0], [], []>} : vector<128x256xbf16>, vector<128x256xbf16>, vector<128x128xf32> -> vector<128x128xf32>
    %6 = vector.shape_cast %5 : vector<128x128xf32> to vector<1x128x128xf32>
    %7 = arith.addf %4, %6 : vector<1x128x128xf32>
    %c0_5 = arith.constant 0 : index
    %c0_6 = arith.constant 0 : index
    %c0_7 = arith.constant 0 : index
    %8 = vector.load %arg4[%c0_5, %c0_6, %c0_7] : memref<1x128x128xf32, #tpu.memory_space<vmem>>, vector<1x128x128xf32>
    tpu.vector_store %arg4[%c0_5, %c0_6, %c0_7], %7 {strides = array<i32>} : memref<1x128x128xf32, #tpu.memory_space<vmem>>, vector<1x128x128xf32>,
    %c0_i32_8 = arith.constant 0 : i32
    %9 = arith.cmpi eq, %arg1, %c0_i32_8 : i32
    %10 = arith.extui %9 : i1 to i32
    %c0_i32_9 = arith.constant 0 : i32
    %11 = arith.cmpi ne, %10, %c0_i32_9 : i32
    scf.if %11 {
      %c0_10 = arith.constant 0 : index
      %c0_11 = arith.constant 0 : index
      %c0_12 = arith.constant 0 : index
      %12 = vector.load %arg4[%c0_10, %c0_11, %c0_12] : memref<1x128x128xf32, #tpu.memory_space<vmem>>, vector<1x128x128xf32>
      %c0_13 = arith.constant 0 : index
      %13 = memref.load %arg3[%c0_13] : memref<1xf32, #tpu.memory_space<smem>>
      %14 = vector.broadcast %13 : f32 to vector<1x128x128xf32>
      %15 = arith.mulf %12, %14 : vector<1x128x128xf32>
      %c0_14 = arith.constant 0 : index
      %c0_15 = arith.constant 0 : index
      %c0_16 = arith.constant 0 : index
      %16 = vector.load %arg4[%c0_14, %c0_15, %c0_16] : memref<1x128x128xf32, #tpu.memory_space<vmem>>, vector<1x128x128xf32>
      tpu.vector_store %arg4[%c0_14, %c0_15, %c0_16], %15 {strides = array<i32>} : memref<1x128x128xf32, #tpu.memory_space<vmem>>, vector<1x128x128xf32>,
    } else {
    }
    return
  }
  func.func @transform_0(%arg0: i32, %arg1: i32) -> (i32, i32) {
    %c1_i32 = arith.constant 1 : i32
    %0 = arith.muli %arg0, %c1_i32 : i32
    %1 = arith.addi %0, %arg1 : i32
    %c0_i32 = arith.constant 0 : i32
    %c0_i32_0 = arith.constant 0 : i32
    return %c0_i32, %1 : i32, i32
  }
  func.func @transform_1(%arg0: i32, %arg1: i32) -> i32 {
    %c0_i32 = arith.constant 0 : i32
    %c0_i32_0 = arith.constant 0 : i32
    return %c0_i32 : i32
  }
  func.func @transform_2(%arg0: i32, %arg1: i32) -> (i32, i32, i32) {
    %c0_i32 = arith.constant 0 : i32
    %c0_i32_0 = arith.constant 0 : i32
    %c0_i32_1 = arith.constant 0 : i32
    return %arg0, %c0_i32, %c0_i32_0 : i32, i32, i32
  }
}

</mosaic_0001>

<bundles_post_ra>
// kernel: tpu_custom_call.1
= control target key start
LH: loop header
LB: loop body
LE: loop exit
PB: predicated region body
PF: predicated region fallthrough
CT: control target
= control target key end

     0   :  { %8 = vsyncpa [#allocation4], 0  ;;  %s594_s0 = inlined_call_operand.hbm [shape: bf16[128,256], index: 0, kind: input, shape index: {}]   ;;  %s595_s1 = inlined_call_operand.<no memory space> [shape: f32[1], index: 1, kind: input, shape index: {}]   ;;  %s596_s2 = inlined_call_operand.hbm [shape: f32[1,128,128], index: 2, kind: output, shape index: {}]  }
   0x1   :  { %9 = vsyncpa [#allocation5], 0  ;;  %s18_s11 = sshll.u32 %s594_s0, 4  ;;  %s522_s12 = smov [#allocation3]   ;;  %s19_s11 = int_to_ptr.hbm [resolvable:$true] %s18_s11 }
   0x2   :  { %s20_s13 = sshll.u32 %s522_s12, 4  ;;  %s523_s14 = smov 128   ;;  %s21_s13 = int_to_ptr.vmem [resolvable:$true] %s20_s13 }
   0x3   :  { %s524_s15 = smov 8  }
   0x4   :  { %26 = dma.hbm_to_vmem [thread:$0]  %s19_s11, 2048, %s21_s13, [#allocation4], %s523_s14, %s523_s14, %s524_s15  }
   0x5   :  { %518 = dma.done.wait [#allocation4], 2048  }
   0x6   :  { %519 = vsyncadd [#allocation4], 4294965248  ;;  %v427_v0 = vld [vmem:[#allocation3 + $0x70] sm:$0xf]  ;;  %v448_v1 = vld [vmem:[#allocation3 + $0x74] sm:$0xf0]  ;;  %v570_v51 = vstv %s595_s1 }
   0x7   :  { %v447_v2 = vld [vmem:[#allocation3 + $0x74] sm:$0xf]  ;;  %v547_v3 = vor.u32 %v448_v1, %v427_v0  ;;  %v429_v4 = vld [vmem:[#allocation3 + $0x78] sm:$0xf0]  ;;  %v419_v6 = vld [vmem:[#allocation3 + $0x60] sm:$0xf] }
   0x8   :  { %v549_v5 = vor.u32 %v447_v2, %v429_v4  ;;  %v446_v7 = vld [vmem:[#allocation3 + $0x64] sm:$0xf0]  ;;  %v445_v8 = vld [vmem:[#allocation3 + $0x64] sm:$0xf]  ;;  %v421_v9 = vld [vmem:[#allocation3 + $0x68] sm:$0xf0] }
   0x9   :  { %167 = vmatpush.bf16.xpose.msra.mxu0 %v547_v3  ;;  %449 = vmatpush.bf16.xpose.msra.mxu2 %v547_v3  ;;  %v555_v10 = vor.u32 %v446_v7, %v419_v6  ;;  %v557_v11 = vor.u32 %v445_v8, %v421_v9  ;;  %v411_v12 = vld [vmem:[#allocation3 + $0x50] sm:$0xf]  ;;  %v444_v13 = vld [vmem:[#allocation3 + $0x54] sm:$0xf0]  ;;  %v443_v14 = vld [vmem:[#allocation3 + $0x54] sm:$0xf] }
   0xa   :  { %216 = vmatpush.bf16.xpose.msra.mxu1 %v549_v5  ;;  %457 = vmatpush.bf16.xpose.msra.mxu3 %v549_v5  ;;  %v413_v15 = vld [vmem:[#allocation3 + $0x58] sm:$0xf0]  ;;  %v412_v16 = vor.u32 %v444_v13, %v411_v12  ;;  %v403_v18 = vld [vmem:[#allocation3 + $0x40] sm:$0xf]  ;;  %v442_v19 = vld [vmem:[#allocation3 + $0x44] sm:$0xf0] }
   0xb   :  { %v416_v17 = vor.u32 %v443_v14, %v413_v15  ;;  %v441_v20 = vld [vmem:[#allocation3 + $0x44] sm:$0xf]  ;;  %v405_v21 = vld [vmem:[#allocation3 + $0x48] sm:$0xf0]  ;;  %v404_v22 = vor.u32 %v442_v19, %v403_v18  ;;  %v395_v24 = vld [vmem:[#allocation3 + $0x30] sm:$0xf] }
   0xc   :  { %v408_v23 = vor.u32 %v441_v20, %v405_v21  ;;  %v440_v25 = vld [vmem:[#allocation3 + $0x34] sm:$0xf0]  ;;  %v439_v26 = vld [vmem:[#allocation3 + $0x34] sm:$0xf]  ;;  %v397_v27 = vld [vmem:[#allocation3 + $0x38] sm:$0xf0] }
   0xd   :  { %v396_v28 = vor.u32 %v440_v25, %v395_v24  ;;  %v400_v29 = vor.u32 %v439_v26, %v397_v27  ;;  %v387_v30 = vld [vmem:[#allocation3 + $0x20] sm:$0xf]  ;;  %v438_v31 = vld [vmem:[#allocation3 + $0x24] sm:$0xf0]  ;;  %v437_v32 = vld [vmem:[#allocation3 + $0x24] sm:$0xf] }
   0xe   :  { %v389_v33 = vld [vmem:[#allocation3 + $0x28] sm:$0xf0]  ;;  %v388_v34 = vor.u32 %v438_v31, %v387_v30  ;;  %v379_v36 = vld [vmem:[#allocation3 + $0x10] sm:$0xf]  ;;  %v436_v37 = vld [vmem:[#allocation3 + $0x14] sm:$0xf0] }
   0xf   :  { %v392_v35 = vor.u32 %v437_v32, %v389_v33  ;;  %v435_v38 = vld [vmem:[#allocation3 + $0x14] sm:$0xf]  ;;  %v381_v39 = vld [vmem:[#allocation3 + $0x18] sm:$0xf0]  ;;  %v380_v40 = vor.u32 %v436_v37, %v379_v36  ;;  %v371_v42 = vld [vmem:[#allocation3] sm:$0xf] }
  0x10   :  { %v384_v41 = vor.u32 %v435_v38, %v381_v39  ;;  %v434_v43 = vld [vmem:[#allocation3 + $0x4] sm:$0xf0]  ;;  %v433_v44 = vld [vmem:[#allocation3 + $0x4] sm:$0xf]  ;;  %v373_v45 = vld [vmem:[#allocation3 + $0x8] sm:$0xf0] }
  0x11   :  { %168 = vmatpush.bf16.xpose.msra.mxu0 %v555_v10  ;;  %450 = vmatpush.bf16.xpose.msra.mxu2 %v555_v10  ;;  %v372_v46 = vor.u32 %v434_v43, %v371_v42  ;;  %v376_v47 = vor.u32 %v433_v44, %v373_v45  ;;  %s525_s1 = smov [#allocation6]   ;;  %s356_s20 = sshll.u32 %s596_s2, 4  ;;  %s357_s20 = int_to_ptr.hbm [resolvable:$true] %s356_s20 }
  0x12   :  { %217 = vmatpush.bf16.xpose.msra.mxu1 %v557_v11  ;;  %458 = vmatpush.bf16.xpose.msra.mxu3 %v557_v11  ;;  %s354_s17 = sshll.u32 %s525_s1, 4  ;;  %s355_s17 = int_to_ptr.vmem [resolvable:$true] %s354_s17 }
  0x19   :  { %169 = vmatpush.bf16.xpose.msra.mxu0 %v412_v16  ;;  %451 = vmatpush.bf16.xpose.msra.mxu2 %v412_v16 }
  0x1a   :  { %218 = vmatpush.bf16.xpose.msra.mxu1 %v416_v17  ;;  %459 = vmatpush.bf16.xpose.msra.mxu3 %v416_v17 }
  0x21   :  { %170 = vmatpush.bf16.xpose.msra.mxu0 %v404_v22  ;;  %452 = vmatpush.bf16.xpose.msra.mxu2 %v404_v22 }
  0x22   :  { %219 = vmatpush.bf16.xpose.msra.mxu1 %v408_v23  ;;  %460 = vmatpush.bf16.xpose.msra.mxu3 %v408_v23 }
  0x29   :  { %171 = vmatpush.bf16.xpose.msra.mxu0 %v396_v28  ;;  %453 = vmatpush.bf16.xpose.msra.mxu2 %v396_v28 }
  0x2a   :  { %220 = vmatpush.bf16.xpose.msra.mxu1 %v400_v29  ;;  %461 = vmatpush.bf16.xpose.msra.mxu3 %v400_v29 }
  0x31   :  { %172 = vmatpush.bf16.xpose.msra.mxu0 %v388_v34  ;;  %454 = vmatpush.bf16.xpose.msra.mxu2 %v388_v34 }
  0x32   :  { %221 = vmatpush.bf16.xpose.msra.mxu1 %v392_v35  ;;  %462 = vmatpush.bf16.xpose.msra.mxu3 %v392_v35 }
  0x39   :  { %173 = vmatpush.bf16.xpose.msra.mxu0 %v380_v40  ;;  %455 = vmatpush.bf16.xpose.msra.mxu2 %v380_v40 }
  0x3a   :  { %222 = vmatpush.bf16.xpose.msra.mxu1 %v384_v41  ;;  %463 = vmatpush.bf16.xpose.msra.mxu3 %v384_v41 }
  0x41   :  { %174 = vmatpush.bf16.xpose.msra.mxu0 %v372_v46  ;;  %456 = vmatpush.bf16.xpose.msra.mxu2 %v372_v46 }
  0x42   :  { %223 = vmatpush.bf16.xpose.msra.mxu1 %v376_v47  ;;  %464 = vmatpush.bf16.xpose.msra.mxu3 %v376_v47 }
  0x48   :  { %175 = vmatmul.bf16.vlgmr.msra.gmra.mxu0 %v372_v46  ;;  %195 = vmatmul.bf16.vlgmr.msra.gmra.mxu2 %v404_v22 }
  0x49   :  { %224 = vmatmul.bf16.vlgmr.msra.gmra.mxu1 %v376_v47  ;;  %244 = vmatmul.bf16.vlgmr.msra.gmra.mxu3 %v408_v23 }
  0x58   :  { %180 = vmatmul.bf16.gmra.mxu0 %v380_v40  ;;  %200 = vmatmul.bf16.gmra.mxu2 %v412_v16 }
  0x59   :  { %229 = vmatmul.bf16.gmra.mxu1 %v384_v41  ;;  %249 = vmatmul.bf16.gmra.mxu3 %v416_v17 }
  0x68   :  { %185 = vmatmul.bf16.gmra.mxu0 %v388_v34  ;;  %205 = vmatmul.bf16.gmra.mxu2 %v555_v10 }
  0x69   :  { %234 = vmatmul.bf16.gmra.mxu1 %v392_v35  ;;  %254 = vmatmul.bf16.gmra.mxu3 %v557_v11 }
  0x78   :  { %190 = vmatmul.bf16.gmra.mxu0 %v396_v28  ;;  %210 = vmatmul.bf16.gmra.mxu2 %v547_v3 }
  0x79   :  { %239 = vmatmul.bf16.gmra.mxu1 %v400_v29  ;;  %259 = vmatmul.bf16.gmra.mxu3 %v549_v5 }
  0xc5   :  { %v176_v48 = vpop.f32.mrf.mxu0 }
  0xc6   :  { %v225_v49 = vpop.f32.mrf.mxu1 }
  0xc7   :  { %v226_v50 = vadd.f32 %v225_v49, %v176_v48 }
  0xc9   :  { %v318_v52 = vmul.f32 %v570_v51, %v226_v50 }
  0xcb   :  { %v196_v53 = vpop.f32.mrf.mxu2  ;;  %334 = vst [vmem:[#allocation6] sm:$0xff] %v318_v52 }
  0xcc   :  { %v245_v54 = vpop.f32.mrf.mxu3 }
  0xcd   :  { %v246_v55 = vadd.f32 %v245_v54, %v196_v53  ;;  %v178_v56 = vpop.f32.mrf.mxu0 }
  0xce   :  { %v227_v57 = vpop.f32.mrf.mxu1 }
  0xcf   :  { %v228_v58 = vadd.f32 %v227_v57, %v178_v56  ;;  %v326_v59 = vmul.f32 %v570_v51, %v246_v55 }
  0xd1   :  { %342 = vst [vmem:[#allocation6 + $0x40] sm:$0xff] %v326_v59  ;;  %v319_v60 = vmul.f32 %v570_v51, %v228_v58 }
  0xd3   :  { %v198_v61 = vpop.f32.mrf.mxu2  ;;  %335 = vst [vmem:[#allocation6 + $0x8] sm:$0xff] %v319_v60 }
  0xd4   :  { %v247_v62 = vpop.f32.mrf.mxu3 }
  0xd5   :  { %v248_v63 = vadd.f32 %v247_v62, %v198_v61  ;;  %v181_v0 = vpop.f32.mrf.mxu0 }
  0xd6   :  { %v230_v1 = vpop.f32.mrf.mxu1 }
  0xd7   :  { %v231_v2 = vadd.f32 %v230_v1, %v181_v0  ;;  %v327_v3 = vmul.f32 %v570_v51, %v248_v63 }
  0xd9   :  { %343 = vst [vmem:[#allocation6 + $0x48] sm:$0xff] %v327_v3  ;;  %v320_v4 = vmul.f32 %v570_v51, %v231_v2 }
  0xdb   :  { %v201_v5 = vpop.f32.mrf.mxu2  ;;  %336 = vst [vmem:[#allocation6 + $0x10] sm:$0xff] %v320_v4 }
  0xdc   :  { %v250_v6 = vpop.f32.mrf.mxu3 }
  0xdd   :  { %v251_v7 = vadd.f32 %v250_v6, %v201_v5  ;;  %v183_v8 = vpop.f32.mrf.mxu0 }
  0xde   :  { %v232_v9 = vpop.f32.mrf.mxu1 }
  0xdf   :  { %v233_v10 = vadd.f32 %v232_v9, %v183_v8  ;;  %v328_v11 = vmul.f32 %v570_v51, %v251_v7 }
  0xe1   :  { %344 = vst [vmem:[#allocation6 + $0x50] sm:$0xff] %v328_v11  ;;  %v321_v12 = vmul.f32 %v570_v51, %v233_v10 }
  0xe3   :  { %v203_v13 = vpop.f32.mrf.mxu2  ;;  %337 = vst [vmem:[#allocation6 + $0x18] sm:$0xff] %v321_v12 }
  0xe4   :  { %v252_v14 = vpop.f32.mrf.mxu3 }
  0xe5   :  { %v253_v15 = vadd.f32 %v252_v14, %v203_v13  ;;  %v186_v16 = vpop.f32.mrf.mxu0 }
  0xe6   :  { %v235_v17 = vpop.f32.mrf.mxu1 }
  0xe7   :  { %v236_v18 = vadd.f32 %v235_v17, %v186_v16  ;;  %v329_v19 = vmul.f32 %v570_v51, %v253_v15 }
  0xe9   :  { %345 = vst [vmem:[#allocation6 + $0x58] sm:$0xff] %v329_v19  ;;  %v322_v20 = vmul.f32 %v570_v51, %v236_v18 }
  0xeb   :  { %v206_v21 = vpop.f32.mrf.mxu2  ;;  %338 = vst [vmem:[#allocation6 + $0x20] sm:$0xff] %v322_v20 }
  0xec   :  { %v255_v22 = vpop.f32.mrf.mxu3 }
  0xed   :  { %v256_v23 = vadd.f32 %v255_v22, %v206_v21  ;;  %v188_v24 = vpop.f32.mrf.mxu0 }
  0xee   :  { %v237_v25 = vpop.f32.mrf.mxu1 }
  0xef   :  { %v238_v26 = vadd.f32 %v237_v25, %v188_v24  ;;  %v330_v27 = vmul.f32 %v570_v51, %v256_v23 }
  0xf1   :  { %346 = vst [vmem:[#allocation6 + $0x60] sm:$0xff] %v330_v27  ;;  %v323_v28 = vmul.f32 %v570_v51, %v238_v26 }
  0xf3   :  { %v208_v29 = vpop.f32.mrf.mxu2  ;;  %339 = vst [vmem:[#allocation6 + $0x28] sm:$0xff] %v323_v28 }
  0xf4   :  { %v257_v30 = vpop.f32.mrf.mxu3 }
  0xf5   :  { %v258_v31 = vadd.f32 %v257_v30, %v208_v29  ;;  %v191_v32 = vpop.f32.mrf.mxu0 }
  0xf6   :  { %v240_v33 = vpop.f32.mrf.mxu1 }
  0xf7   :  { %v241_v34 = vadd.f32 %v240_v33, %v191_v32  ;;  %v331_v35 = vmul.f32 %v570_v51, %v258_v31 }
  0xf9   :  { %347 = vst [vmem:[#allocation6 + $0x68] sm:$0xff] %v331_v35  ;;  %v324_v36 = vmul.f32 %v570_v51, %v241_v34 }
  0xfb   :  { %v211_v37 = vpop.f32.mrf.mxu2  ;;  %340 = vst [vmem:[#allocation6 + $0x30] sm:$0xff] %v324_v36 }
  0xfc   :  { %v260_v38 = vpop.f32.mrf.mxu3 }
  0xfd   :  { %v261_v39 = vadd.f32 %v260_v38, %v211_v37  ;;  %v193_v40 = vpop.f32.mrf.mxu0 }
  0xfe   :  { %v242_v41 = vpop.f32.mrf.mxu1 }
  0xff   :  { %v243_v42 = vadd.f32 %v242_v41, %v193_v40  ;;  %v332_v43 = vmul.f32 %v570_v51, %v261_v39 }
 0x101   :  { %348 = vst [vmem:[#allocation6 + $0x70] sm:$0xff] %v332_v43  ;;  %v325_v44 = vmul.f32 %v570_v51, %v243_v42 }
 0x103   :  { %v213_v45 = vpop.f32.mrf.mxu2  ;;  %341 = vst [vmem:[#allocation6 + $0x38] sm:$0xff] %v325_v44 }
 0x104   :  { %v262_v46 = vpop.f32.mrf.mxu3 }
 0x105   :  { %v263_v47 = vadd.f32 %v262_v46, %v213_v45 }
 0x107   :  { %v333_v48 = vmul.f32 %v570_v51, %v263_v47 }
 0x109   :  { %349 = vst [vmem:[#allocation6 + $0x78] sm:$0xff] %v333_v48 }
 0x10a   :  { %362 = dma.vmem_to_hbm [thread:$0]  %s355_s17, 2048, %s357_s20, [#allocation5], %s523_s14, %s523_s14, %s524_s15  }
 0x10b   :  { %520 = dma.done.wait [#allocation5], 2048  }
 0x10c   :  { %521 = vsyncadd [#allocation5], 4294965248 }
 0x10d   :  { %367 = vsyncpa [#allocation4], 1 }
 0x10e   :  { %368 = vsyncpa [#allocation5], 1 }

</bundles_post_ra>
